<compile_context>
chip_gen: v7x
topology: tpu7x:2x2x1
jax: 0.10.0
libtpu: 0.0.40
codegen_flags: <defaults>
</compile_context>

<pallas_src>
import jax
import jax.numpy as jnp
from jax.experimental import pallas as pl
from jax.experimental.pallas import tpu as pltpu


# --------------------------------------------------------------------------
# Kernel: one fused, lane-dense MXU pass per batch tile
# --------------------------------------------------------------------------
def _fused_head_kernel(phi_ref, w_ref, b_ref, out_ref):
    # (TILE_B, S_pad) @ (S_pad, OUT_PAD) -> f32 accumulate, + fused bias row
    out_ref[...] = (
        jnp.dot(phi_ref[...], w_ref[...], preferred_element_type=jnp.float32)
        + b_ref[...]
    ).astype(out_ref.dtype)


def _round_up(x, m):
    return ((x + m - 1) // m) * m


# --------------------------------------------------------------------------
# Wrapper (layout plumbing: fuse/pad weights, tile batch, slice outputs)
# --------------------------------------------------------------------------
def rl_categorical_actor_critic_head(phi, params, use_intrinsic_critic=False,
                                     compute_dtype=jnp.float32, tile_b=512):
    """Returns (ext_v, int_v, action_logit) exactly as the PyTorch forward."""
    B, S = phi.shape
    A = params["w_action"].shape[0]
    n_heads = 2 + (1 if use_intrinsic_critic else 0)
    OUT = A + (n_heads - 1)                      # A logits + 1 or 2 values

    # ---- fused, padded weight / bias -------------------------------------
    S_pad = _round_up(S, 128)
    OUT_PAD = _round_up(max(OUT, 128), 128)

    w_parts = [params["w_action"].T, params["w_ext_critic"].T]   # (S, *)
    b_parts = [params["b_action"], params["b_ext_critic"]]
    if use_intrinsic_critic:
        w_parts.append(params["w_int_critic"].T)
        b_parts.append(params["b_int_critic"])
    w_cat = jnp.concatenate(w_parts, axis=1)                     # (S, OUT)
    b_cat = jnp.concatenate(b_parts, axis=0)                     # (OUT,)

    w_pad = jnp.zeros((S_pad, OUT_PAD), compute_dtype)
    w_pad = w_pad.at[:S, :OUT].set(w_cat.astype(compute_dtype))
    b_pad = jnp.zeros((1, OUT_PAD), jnp.float32)
    b_pad = b_pad.at[0, :OUT].set(b_cat.astype(jnp.float32))

    # ---- pad batch (sublanes) + features (lanes), pick batch tile --------
    B8 = _round_up(B, 8)
    TILE_B = min(tile_b, B8)
    B_pad = _round_up(B8, TILE_B)
    phi_pad = jnp.zeros((B_pad, S_pad), compute_dtype)
    phi_pad = phi_pad.at[:B, :S].set(phi.astype(compute_dtype))

    itemsize = jnp.dtype(compute_dtype).itemsize
    out = pl.pallas_call(
        _fused_head_kernel,
        out_shape=jax.ShapeDtypeStruct((B_pad, OUT_PAD), jnp.float32),
        grid=(B_pad // TILE_B,),
        in_specs=[
            pl.BlockSpec((TILE_B, S_pad), lambda i: (i, 0)),     # phi tile
            pl.BlockSpec((S_pad, OUT_PAD), lambda i: (0, 0)),    # fused W
            pl.BlockSpec((1, OUT_PAD), lambda i: (0, 0)),        # fused bias
        ],
        out_specs=pl.BlockSpec((TILE_B, OUT_PAD), lambda i: (i, 0)),
        compiler_params=pltpu.CompilerParams(
            dimension_semantics=("parallel",)),
        cost_estimate=pl.CostEstimate(
            flops=2 * B_pad * S_pad * OUT_PAD,
            transcendentals=0,
            bytes_accessed=(itemsize * (B_pad * S_pad + S_pad * OUT_PAD)
                            + 4 * B_pad * OUT_PAD)),
    )(phi_pad, w_pad, b_pad)

    # ---- slice the lane-dense slab back into the three heads --------------
    logits = out[:B, :A]
    ext_v = out[:B, A:A + 1]
    int_v = out[:B, A + 1:A + 2] if use_intrinsic_critic else None
    return ext_v, int_v, logits


# --------------------------------------------------------------------------
# Deterministic parameter init (mimics layer_init: orthogonal W * scale, b=0)
# --------------------------------------------------------------------------
def _orthogonal(key, out_dim, in_dim, scale):
    big, small = max(out_dim, in_dim), min(out_dim, in_dim)
    a = jax.random.normal(key, (big, small), dtype=jnp.float32)
    q, r = jnp.linalg.qr(a)
    q = q * jnp.sign(jnp.diagonal(r))
    if out_dim < in_dim:
        q = q.T
    return (scale * q).astype(jnp.float32)


def make_params(key, state_dim, action_dim, use_intrinsic_critic=False):
    k_act, k_ext, k_int = jax.random.split(key, 3)
    params = {
        "w_action": _orthogonal(k_act, action_dim, state_dim, 0.01),
        "b_action": jnp.zeros((action_dim,), jnp.float32),
        "w_ext_critic": _orthogonal(k_ext, 1, state_dim, 1.0),
        "b_ext_critic": jnp.zeros((1,), jnp.float32),
    }
    if use_intrinsic_critic:
        params["w_int_critic"] = _orthogonal(k_int, 1, state_dim, 1.0)
        params["b_int_critic"] = jnp.zeros((1,), jnp.float32)
    return params


# --------------------------------------------------------------------------
# Main
# --------------------------------------------------------------------------
if __name__ == "__main__":
    B, STATE_DIM, ACTION_DIM = 2, 32, 8

    key = jax.random.PRNGKey(0)
    k_phi, k_params = jax.random.split(key)
    phi = jax.random.normal(k_phi, (B, STATE_DIM), dtype=jnp.float32)

    ok = True
    for use_int in (False, True):
        params = make_params(k_params, STATE_DIM, ACTION_DIM,
                             use_intrinsic_critic=use_int)
        ext_v, int_v, logits = rl_categorical_actor_critic_head(
            phi, params, use_intrinsic_critic=use_int)
        jax.block_until_ready(logits)
        jax.block_until_ready(ext_v)

        # pure-JAX reference (same semantics as nn.Linear: x @ W.T + b)
        ref_logits = phi @ params["w_action"].T + params["b_action"]
        ref_ext_v = phi @ params["w_ext_critic"].T + params["b_ext_critic"]
        ok &= bool(jnp.allclose(logits, ref_logits, atol=1e-5))
        ok &= bool(jnp.allclose(ext_v, ref_ext_v, atol=1e-5))
        ok &= (ext_v.shape == (B, 1)) and (logits.shape == (B, ACTION_DIM))
        if use_int:
            ref_int_v = (phi @ params["w_int_critic"].T
                         + params["b_int_critic"])
            jax.block_until_ready(int_v)
            ok &= bool(jnp.allclose(int_v, ref_int_v, atol=1e-5))
            ok &= int_v.shape == (B, 1)
        else:
            ok &= int_v is None

    # TODO(synk): the `compute()` stream method also performs softmax /
    # entropy / torch.multinomial sampling (stateful RNG per call); only
    # forward() is implemented as the Pallas hot path here.
    if ok:
        print("KERNEL_OK")
</pallas_src>

<mosaic_0001>
module attributes {stable_mosaic.version = 11 : i64} {
  func.func @_fused_head_kernel(%arg0: i32, %arg1: memref<8x128xf32, #tpu.memory_space<vmem>>, %arg2: memref<128x128xf32, #tpu.memory_space<vmem>>, %arg3: memref<1x128xf32, #tpu.memory_space<vmem>>, %arg4: memref<8x128xf32, #tpu.memory_space<vmem>>) attributes {dimension_semantics = [#tpu.dimension_semantics<parallel>], iteration_bounds = array<i64: 1>, scalar_prefetch = 0 : i64, scratch_operands = 0 : i64, tpu.core_type = #tpu.core_type<tc>, window_params = [{transform_indices = @transform_0, window_bounds = array<i64: 8, 128>}, {pipeline_mode = #tpu.pipeline_mode<synchronous>, transform_indices = @transform_1, window_bounds = array<i64: 128, 128>}, {pipeline_mode = #tpu.pipeline_mode<synchronous>, transform_indices = @transform_2, window_bounds = array<i64: 1, 128>}, {transform_indices = @transform_3, window_bounds = array<i64: 8, 128>}]} {
    %c0 = arith.constant 0 : index
    %c0_0 = arith.constant 0 : index
    %0 = vector.load %arg1[%c0, %c0_0] : memref<8x128xf32, #tpu.memory_space<vmem>>, vector<8x128xf32>
    %c0_1 = arith.constant 0 : index
    %c0_2 = arith.constant 0 : index
    %1 = vector.load %arg2[%c0_1, %c0_2] : memref<128x128xf32, #tpu.memory_space<vmem>>, vector<128x128xf32>
    %cst = arith.constant dense<0.000000e+00> : vector<8x128xf32>
    %2 = tpu.matmul %0, %1, %cst {dimension_numbers = #tpu.dot_dimension_numbers<[1], [0], [0], [1], [0, 0, 1, 1], [], []>} : vector<8x128xf32>, vector<128x128xf32>, vector<8x128xf32> -> vector<8x128xf32>
    %c0_3 = arith.constant 0 : index
    %c0_4 = arith.constant 0 : index
    %3 = vector.load %arg3[%c0_3, %c0_4] : memref<1x128xf32, #tpu.memory_space<vmem>>, vector<1x128xf32>
    %4 = vector.broadcast %3 : vector<1x128xf32> to vector<8x128xf32>
    %5 = arith.addf %2, %4 : vector<8x128xf32>
    %c0_5 = arith.constant 0 : index
    %c0_6 = arith.constant 0 : index
    %6 = vector.load %arg4[%c0_5, %c0_6] : memref<8x128xf32, #tpu.memory_space<vmem>>, vector<8x128xf32>
    tpu.vector_store %arg4[%c0_5, %c0_6], %5 {strides = array<i32>} : memref<8x128xf32, #tpu.memory_space<vmem>>, vector<8x128xf32>,
    return
  }
  func.func @transform_0(%arg0: i32) -> (i32, i32) {
    %c0_i32 = arith.constant 0 : i32
    %c0_i32_0 = arith.constant 0 : i32
    return %arg0, %c0_i32 : i32, i32
  }
  func.func @transform_1(%arg0: i32) -> (i32, i32) {
    %c0_i32 = arith.constant 0 : i32
    %c0_i32_0 = arith.constant 0 : i32
    %c0_i32_1 = arith.constant 0 : i32
    return %c0_i32, %c0_i32_0 : i32, i32
  }
  func.func @transform_2(%arg0: i32) -> (i32, i32) {
    %c0_i32 = arith.constant 0 : i32
    %c0_i32_0 = arith.constant 0 : i32
    %c0_i32_1 = arith.constant 0 : i32
    return %c0_i32, %c0_i32_0 : i32, i32
  }
  func.func @transform_3(%arg0: i32) -> (i32, i32) {
    %c0_i32 = arith.constant 0 : i32
    %c0_i32_0 = arith.constant 0 : i32
    return %arg0, %c0_i32 : i32, i32
  }
}

</mosaic_0001>

<bundles_post_ra>
// kernel: tpu_custom_call.1
= control target key start
LH: loop header
LB: loop body
LE: loop exit
PB: predicated region body
PF: predicated region fallthrough
CT: control target
= control target key end

     0   :  { %8 = vsyncpa [#allocation3], 0  ;;  %s383_s0 = inlined_call_operand.hbm [shape: f32[8,128], index: 0, kind: input, shape index: {}]   ;;  %s384_s1 = inlined_call_operand.hbm [shape: f32[128,128], index: 1, kind: input, shape index: {}]   ;;  %s385_s2 = inlined_call_operand.vmem [shape: f32[1,128], index: 2, kind: input, shape index: {}]   ;;  %s386_s3 = inlined_call_operand.hbm [shape: f32[8,128], index: 3, kind: output, shape index: {}]  }
   0x1   :  { %9 = vsyncpa [#allocation6], 0 }
   0x2   :  { %10 = vsyncpa [#allocation4], 0  ;;  %s309_s12 = smov [#allocation2]   ;;  %s310_s14 = smov [#allocation5]  }
   0x3   :  { %s17_s13 = sshll.u32 %s309_s12, 4  ;;  %s26_s15 = sshll.u32 %s310_s14, 4  ;;  %s18_s13 = int_to_ptr.vmem [resolvable:$true] %s17_s13  ;;  %s337_s15 = int_to_ptr.vmem [resolvable:$true] %s26_s15 }
   0x4   :  { %s237_s18 = scalar_lea.hbm %s383_s0, 128 }
   0x5   :  { %p238_p0 = scmp.ne.s32.totalorder %s383_s0, %s237_s18  ;;  %p241_p1 = scmp.lt.u32.totalorder %s237_s18, %s383_s0 }
   0x7   :  { %p243_p2 = pnand %p241_p1, %p238_p0 }
   0x9   :  { %246 = shalt.err (!%p243_p2)
}
   0xa   :  { %s247_s23 = scalar_lea.vmem %s18_s13, 128  ;;  %p252_p4 = scmp.lt.s32.totalorder %s18_s13, %s18_s13 }
   0xb   :  { %p248_p3 = scmp.ne.s32.totalorder %s18_s13, %s247_s23  ;;  %p253_p5 = scmp.lt.s32.totalorder %s247_s23, %s247_s23 }
   0xd   :  { %p254_p6 = por %p253_p5, %p252_p4 }
   0xf   :  { %p255_p7 = pnand %p254_p6, %p248_p3 }
  0x11   :  { %258 = shalt.err (!%p255_p7)
}
  0x12   :  { %20 = dma.hbm_to_vmem [thread:$0]  %s383_s0, 128, %s18_s13, [#allocation3]  }
  0x13   :  { %s259_s28 = scalar_lea.hbm %s384_s1, 2048 }
  0x14   :  { %p260_p8 = scmp.ne.s32.totalorder %s384_s1, %s259_s28  ;;  %p263_p9 = scmp.lt.u32.totalorder %s259_s28, %s384_s1 }
  0x16   :  { %p265_p10 = pnand %p263_p9, %p260_p8 }
  0x18   :  { %268 = shalt.err (!%p265_p10)
}
  0x19   :  { %s269_s6 = scalar_lea.vmem %s337_s15, 2048  ;;  %p274_p12 = scmp.lt.s32.totalorder %s337_s15, %s337_s15 }
  0x1a   :  { %p270_p11 = scmp.ne.s32.totalorder %s337_s15, %s269_s6  ;;  %p275_p13 = scmp.lt.s32.totalorder %s269_s6, %s269_s6 }
  0x1c   :  { %p276_p0 = por %p275_p13, %p274_p12 }
  0x1e   :  { %p277_p1 = pnand %p276_p0, %p270_p11 }
  0x20   :  { %280 = shalt.err (!%p277_p1)
}
  0x21   :  { %s311_s0 = smov 128   ;;  %s312_s7 = smov 8  }
  0x22   :  { %32 = dma.hbm_to_vmem [thread:$0]  %s384_s1, 2048, %s337_s15, [#allocation6], %s311_s0, %s311_s0, %s312_s7  }
  0x23   :  { %303 = dma.done.wait [#allocation3], 128  }
  0x24   :  { %304 = vsyncadd [#allocation3], 4294967168 }
  0x25   :  { %305 = dma.done.wait [#allocation6], 2048  }
  0x26   :  { %306 = vsyncadd [#allocation6], 4294965248  ;;  %v313_v0 = vmov 0.0|0.0   ;;  %vm314_vm0 = vmmov 0   ;;  %v315_v1 = vmov 0.0   ;;  %v42_v2 = vld [vmem:[#allocation5] sm:$0xff] }
  0x27   :  { %205 = vmatprep.subr.bf16.mxu0 %v313_v0  ;;  %202 = vmatprep.mubr.msk.f32.mxu0 %vm314_vm0, %v315_v1  ;;  %v43_v3 = vld [vmem:[#allocation5 + $0x8] sm:$0xff]  ;;  %v44_v4 = vld [vmem:[#allocation5 + $0x10] sm:$0xff]  ;;  %v45_v6 = vld [vmem:[#allocation5 + $0x18] sm:$0xff]  ;;  %s316_s11 = smov [#allocation7]  }
  0x28   :  { %v206_v5 = vpack.c.bf16 %v43_v3, %v42_v2  ;;  %v209_v7 = vpack.c.bf16 %v45_v6, %v44_v4  ;;  %v46_v8 = vld [vmem:[#allocation5 + $0x20] sm:$0xff]  ;;  %v47_v9 = vld [vmem:[#allocation5 + $0x28] sm:$0xff]  ;;  %v48_v11 = vld [vmem:[#allocation5 + $0x30] sm:$0xff]  ;;  %s142_s12 = sshll.u32 %s316_s11, 4  ;;  %s143_s12 = int_to_ptr.vmem [resolvable:$true] %s142_s12 }
  0x29   :  { %v212_v10 = vpack.c.bf16 %v47_v9, %v46_v8  ;;  %v49_v12 = vld [vmem:[#allocation5 + $0x38] sm:$0xff]  ;;  %v50_v14 = vld [vmem:[#allocation5 + $0x40] sm:$0xff]  ;;  %v51_v15 = vld [vmem:[#allocation5 + $0x48] sm:$0xff]  ;;  %s281_s13 = scalar_lea.vmem %s143_s12, 128  ;;  %p286_p3 = scmp.lt.s32.totalorder %s143_s12, %s143_s12 }
  0x2a   :  { %207 = vmatpush3.bf16.msra.mxu0 %v206_v5  ;;  %v215_v13 = vpack.c.bf16 %v49_v12, %v48_v11  ;;  %v218_v16 = vpack.c.bf16 %v51_v15, %v50_v14  ;;  %v52_v17 = vld [vmem:[#allocation5 + $0x50] sm:$0xff]  ;;  %v53_v18 = vld [vmem:[#allocation5 + $0x58] sm:$0xff]  ;;  %v54_v20 = vld [vmem:[#allocation5 + $0x60] sm:$0xff]  ;;  %p282_p2 = scmp.ne.s32.totalorder %s143_s12, %s281_s13  ;;  %p287_p4 = scmp.lt.s32.totalorder %s281_s13, %s281_s13 }
  0x2b   :  { %208 = vmatprep.subr.bf16.mxu0 %v313_v0  ;;  %v221_v19 = vpack.c.bf16 %v53_v18, %v52_v17  ;;  %v55_v21 = vld [vmem:[#allocation5 + $0x68] sm:$0xff]  ;;  %v56_v23 = vld [vmem:[#allocation5 + $0x70] sm:$0xff]  ;;  %v57_v24 = vld [vmem:[#allocation5 + $0x78] sm:$0xff] }
  0x2c   :  { %v224_v22 = vpack.c.bf16 %v55_v21, %v54_v20  ;;  %v227_v25 = vpack.c.bf16 %v57_v24, %v56_v23  ;;  %v41_v26 = vld [vmem:[#allocation2] sm:$0xff]  ;;  %p288_p5 = por %p287_p4, %p286_p3 }
  0x2d   :  { %v152_v27 = vld [vmem:[%s385_s2] ss:$0 sm:$0xff] }
  0x2e   :  { %210 = vmatpush3.bf16.msra.mxu0 %v209_v7  ;;  %p289_p6 = pnand %p288_p5, %p282_p2 }
  0x2f   :  { %211 = vmatprep.subr.bf16.mxu0 %v313_v0 }
  0x32   :  { %213 = vmatpush3.bf16.msra.mxu0 %v212_v10 }
  0x33   :  { %214 = vmatprep.subr.bf16.mxu0 %v313_v0 }
  0x36   :  { %216 = vmatpush3.bf16.msra.mxu0 %v215_v13 }
  0x37   :  { %217 = vmatprep.subr.bf16.mxu0 %v313_v0 }
  0x3a   :  { %219 = vmatpush3.bf16.msra.mxu0 %v218_v16 }
  0x3b   :  { %220 = vmatprep.subr.bf16.mxu0 %v313_v0 }
  0x3e   :  { %222 = vmatpush3.bf16.msra.mxu0 %v221_v19 }
  0x3f   :  { %223 = vmatprep.subr.bf16.mxu0 %v313_v0 }
  0x42   :  { %225 = vmatpush3.bf16.msra.mxu0 %v224_v22 }
  0x43   :  { %226 = vmatprep.subr.bf16.mxu0 %v313_v0 }
  0x46   :  { %228 = vmatpush3.bf16.msra.mxu0 %v227_v25 }
  0x49   :  { %203 = vmatmul.mubr.f32.vlgmr.msra.gmra.mrb[0].mxu0 %v41_v26 }
 0x11c   :  { %v131_v28 = vpop.f32.mrb[0].mxu0 }
 0x11d   :  { %v132_v29 = vadd.f32 %v152_v27, %v131_v28  ;;  %v204_v30 = vpop.f32.mrb[1].mxu0 }
 0x11f   :  { %135 = vst [vmem:[#allocation7] sm:$0xff] %v132_v29 }
 0x120   :  { %292 = shalt.err (!%p289_p6)
}
 0x121   :  { %s293_s16 = scalar_lea.hbm %s386_s3, 128 }
 0x122   :  { %p294_p7 = scmp.ne.s32.totalorder %s386_s3, %s293_s16  ;;  %p297_p8 = scmp.lt.u32.totalorder %s293_s16, %s386_s3 }
 0x124   :  { %p299_p9 = pnand %p297_p8, %p294_p7 }
 0x126   :  { %302 = shalt.err (!%p299_p9)
}
 0x127   :  { %145 = dma.vmem_to_hbm [thread:$0]  %s143_s12, 128, %s386_s3, [#allocation4]  }
 0x128   :  { %307 = dma.done.wait [#allocation4], 128  }
 0x129   :  { %308 = vsyncadd [#allocation4], 4294967168 }
 0x12a   :  { %149 = vsyncpa [#allocation3], 1 }
 0x12b   :  { %150 = vsyncpa [#allocation6], 1 }
 0x12c   :  { %151 = vsyncpa [#allocation4], 1 }

</bundles_post_ra>
